<compile_context>
chip_gen: v5e
topology: v5e:2x2
jax: 0.10.0
libtpu: 0.0.40
codegen_flags: <defaults>
</compile_context>

<pallas_src>
from functools import partial

import jax
import jax.numpy as jnp
from jax.experimental import pallas as pl
from jax.experimental.pallas import tpu as pltpu


def _label_smoothing_kernel(labels_ref, pred_ref, out_ref, *, eps, num_label):
    x = pred_ref[...].astype(jnp.float32)       # (TILE_B, C) f32 (per-tile upcast)
    y = labels_ref[...]                          # (TILE_B, 1)  int32

    # log_softmax pieces (class axis = lanes); everything on `shifted`.
    m = jnp.max(x, axis=-1, keepdims=True)                               # (TILE_B, 1)
    shifted = x - m
    lse = jnp.log(jnp.sum(jnp.exp(shifted), axis=-1, keepdims=True))     # (TILE_B, 1)

    # Fused smoothed-one-hot weighting:
    #   w_c       = eps/C + (1 - eps - eps/C) * [c == y]
    #   sum_c w_c = 1 - eps/C
    #   loss      = -(sum_c w_c * (shifted_c - lse))
    #             = (1 - eps/C) * lse - sum_c w_c * shifted_c
    coeff = eps / num_label
    cls = jax.lax.broadcasted_iota(jnp.int32, x.shape, 1)
    w = jnp.where(cls == y, jnp.float32(1.0 - eps), jnp.float32(coeff))  # (TILE_B, C)
    wsum = jnp.sum(w * shifted, axis=-1, keepdims=True)                  # (TILE_B, 1)

    loss = (1.0 - coeff) * lse - wsum                                    # (TILE_B, 1)
    out_ref[...] = loss.reshape(1, -1)                                   # (1, TILE_B)


def _per_row_vmem_bytes(num_classes, itemsize):
    # pred tile, native dtype, double-buffered          : 2 * C * itemsize
    # ~4 full-tile f32 temporaries (upcast/shifted/exp/
    #  weights-products; compiler may reuse buffers)    : 4 * C * 4
    # labels tile: (TILE_B, 1) i32 lane-pads to 128
    #  lanes, double-buffered                           : 2 * 128 * 4
    return 2 * num_classes * itemsize + 4 * num_classes * 4 + 2 * 128 * 4


_TARGET_PRED_BYTES = 4 * 1024 * 1024    # per-step pred DMA target (amortizes ~0.35us/step)
_VMEM_TILE_BUDGET = 24 * 1024 * 1024    # estimated per-step footprint cap (v7x-safe)


def _choose_tile_b(batch, num_classes, itemsize):
    per_row_pred = max(1, num_classes * itemsize)
    per_row_vmem = _per_row_vmem_bytes(num_classes, itemsize)

    tb = min(_TARGET_PRED_BYTES // per_row_pred,
             _VMEM_TILE_BUDGET // per_row_vmem)
    tb = max(128, (tb // 128) * 128)

    b128 = pl.cdiv(batch, 128) * 128
    if b128 >= 256:
        # Keep at least 2 grid steps so the "parallel" batch axis can shard
        # across both TensorCores on v7x (no-op on 1-TC v5e/v6e).
        tb = min(tb, max(128, ((b128 // 2) // 128) * 128))
    return min(tb, b128)


def label_smoothing_loss(y_pred, y_gt, *, label_smoothing, num_label):
    """y_pred: (B, C) float, y_gt: (B,) int -> loss (B,) float32."""
    assert 0.0 < label_smoothing <= 1.0
    B, C = y_pred.shape
    assert C == num_label
    itemsize = jnp.dtype(y_pred.dtype).itemsize

    tile_b = _choose_tile_b(B, C, itemsize)
    if tile_b >= B:
        # Single-block case: shrink to the smallest legal block (multiple of 8
        # sublanes). The output block then equals the full output dim, so the
        # 128-lane rule is satisfied by "block == full dim".
        tile_b = max(8, pl.cdiv(B, 8) * 8)

    grid_b = pl.cdiv(B, tile_b)
    b_out = grid_b * tile_b        # only the tiny f32 output is padded; inputs
                                   # are NOT padded -- the last (partial) block
                                   # clamps at B and its outputs are sliced off.

    labels_2d = y_gt.astype(jnp.int32).reshape(B, 1)

    est_vmem = tile_b * _per_row_vmem_bytes(C, itemsize) + (2 << 20)
    vmem_limit = int(min(max(est_vmem, 32 << 20), 56 << 20))   # <= v7x 64 MiB physical

    cost = pl.CostEstimate(
        flops=7 * B * C,
        transcendentals=B * C + B,
        bytes_accessed=B * C * itemsize + B * 4 + B * 4,
    )

    # If profiling shows exposed DMA at very small tiles (< ~1 MiB of pred per
    # step), sweeping pipeline_mode=pl.Buffered(3) on the pred spec is the next
    # cheap knob; default double-buffering is kept here.
    out = pl.pallas_call(
        partial(_label_smoothing_kernel, eps=float(label_smoothing),
                num_label=float(num_label)),
        out_shape=jax.ShapeDtypeStruct((1, b_out), jnp.float32),
        grid=(grid_b,),
        in_specs=[
            pl.BlockSpec((tile_b, 1), lambda i: (i, 0)),   # labels tile
            pl.BlockSpec((tile_b, C), lambda i: (i, 0)),   # pred tile (native dtype)
        ],
        out_specs=pl.BlockSpec((1, tile_b), lambda i: (0, i)),
        compiler_params=pltpu.CompilerParams(
            dimension_semantics=("parallel",),
            vmem_limit_bytes=vmem_limit),
        cost_estimate=cost,
    )(labels_2d, y_pred)

    return out.reshape(b_out)[:B]


if __name__ == "__main__":
    eps = 0.1
    key = jax.random.PRNGKey(0)
    k1, k2, k3, k4 = jax.random.split(key, 4)

    def ref_loss(y_pred, y_gt, eps, C):
        one_hot = jax.nn.one_hot(y_gt, C, dtype=jnp.float32)
        smooth = one_hot * (1.0 - eps) + (1.0 - one_hot) * (eps / C)
        logp = jax.nn.log_softmax(y_pred.astype(jnp.float32), axis=-1)
        return -(smooth * logp).sum(-1)

    # Primary small shape consistent with the module (batch=8, num_label=32).
    B, C = 8, 32
    y_pred = jax.random.normal(k1, (B, C), dtype=jnp.float32)
    y_gt = jax.random.randint(k2, (B,), 0, C, dtype=jnp.int32)
    loss = jax.block_until_ready(
        label_smoothing_loss(y_pred, y_gt, label_smoothing=eps, num_label=C))
    assert loss.shape == (B,)
    assert jnp.allclose(loss, ref_loss(y_pred, y_gt, eps, C), atol=1e-4, rtol=1e-5)

    # Secondary check: multi-step grid with a ragged last block (no input pad).
    B2, C2 = 300, 160
    y_pred2 = jax.random.normal(k3, (B2, C2), dtype=jnp.float32)
    y_gt2 = jax.random.randint(k4, (B2,), 0, C2, dtype=jnp.int32)
    loss2 = jax.block_until_ready(
        label_smoothing_loss(y_pred2, y_gt2, label_smoothing=eps, num_label=C2))
    assert loss2.shape == (B2,)
    assert jnp.allclose(loss2, ref_loss(y_pred2, y_gt2, eps, C2), atol=1e-4, rtol=1e-5)

    print("KERNEL_OK")
</pallas_src>

<mosaic_0001>
module attributes {stable_mosaic.version = 11 : i64} {
  func.func @_label_smoothing_kernel(%arg0: i32, %arg1: memref<8x1xi32, #tpu.memory_space<vmem>>, %arg2: memref<8x32xf32, #tpu.memory_space<vmem>>, %arg3: memref<1x8xf32, #tpu.memory_space<vmem>>) attributes {dimension_semantics = [#tpu.dimension_semantics<parallel>], iteration_bounds = array<i64: 1>, scalar_prefetch = 0 : i64, scratch_operands = 0 : i64, tpu.core_type = #tpu.core_type<tc>, window_params = [{transform_indices = @transform_0, window_bounds = array<i64: 8, 1>}, {transform_indices = @transform_1, window_bounds = array<i64: 8, 32>}, {transform_indices = @transform_2, window_bounds = array<i64: 1, 8>}]} {
    %c0 = arith.constant 0 : index
    %c0_0 = arith.constant 0 : index
    %0 = vector.load %arg2[%c0, %c0_0] : memref<8x32xf32, #tpu.memory_space<vmem>>, vector<8x32xf32>
    %c0_1 = arith.constant 0 : index
    %c0_2 = arith.constant 0 : index
    %1 = vector.load %arg1[%c0_1, %c0_2] : memref<8x1xi32, #tpu.memory_space<vmem>>, vector<8x1xi32>
    %cst = arith.constant dense<0xFF800000> : vector<8xf32>
    %2 = vector.multi_reduction <maximumf>, %0, %cst [1] : vector<8x32xf32> to vector<8xf32>
    %3 = vector.shape_cast %2 : vector<8xf32> to vector<8x1xf32>
    %4 = vector.broadcast %3 : vector<8x1xf32> to vector<8x32xf32>
    %5 = arith.subf %0, %4 : vector<8x32xf32>
    %6 = math.exp %5 : vector<8x32xf32>
    %cst_3 = arith.constant dense<0.000000e+00> : vector<8xf32>
    %7 = vector.multi_reduction <add>, %6, %cst_3 [1] : vector<8x32xf32> to vector<8xf32>
    %8 = vector.shape_cast %7 : vector<8xf32> to vector<8x1xf32>
    %9 = math.log %8 : vector<8x1xf32>
    %10 = tpu.iota {dimensions = array<i32: 1>} : vector<8x32xi32>
    %11 = vector.broadcast %1 : vector<8x1xi32> to vector<8x32xi32>
    %12 = arith.cmpi eq, %10, %11 : vector<8x32xi32>
    %cst_4 = arith.constant 0.899999976 : f32
    %cst_5 = arith.constant 3.125000e-03 : f32
    %13 = vector.broadcast %cst_4 : f32 to vector<8x32xf32>
    %14 = vector.broadcast %cst_5 : f32 to vector<8x32xf32>
    %15 = arith.select %12, %13, %14 : vector<8x32xi1>, vector<8x32xf32>
    %16 = arith.mulf %15, %5 : vector<8x32xf32>
    %cst_6 = arith.constant dense<0.000000e+00> : vector<8xf32>
    %17 = vector.multi_reduction <add>, %16, %cst_6 [1] : vector<8x32xf32> to vector<8xf32>
    %18 = vector.shape_cast %17 : vector<8xf32> to vector<8x1xf32>
    %cst_7 = arith.constant 0.996874988 : f32
    %19 = vector.broadcast %cst_7 : f32 to vector<8x1xf32>
    %20 = arith.mulf %19, %9 : vector<8x1xf32>
    %21 = arith.subf %20, %18 : vector<8x1xf32>
    %22 = vector.shape_cast %21 : vector<8x1xf32> to vector<1x8xf32>
    %c0_8 = arith.constant 0 : index
    %c0_9 = arith.constant 0 : index
    %23 = vector.load %arg3[%c0_8, %c0_9] : memref<1x8xf32, #tpu.memory_space<vmem>>, vector<1x8xf32>
    tpu.vector_store %arg3[%c0_8, %c0_9], %22 {strides = array<i32>} : memref<1x8xf32, #tpu.memory_space<vmem>>, vector<1x8xf32>,
    return
  }
  func.func @transform_0(%arg0: i32) -> (i32, i32) {
    %c0_i32 = arith.constant 0 : i32
    %c0_i32_0 = arith.constant 0 : i32
    return %arg0, %c0_i32 : i32, i32
  }
  func.func @transform_1(%arg0: i32) -> (i32, i32) {
    %c0_i32 = arith.constant 0 : i32
    %c0_i32_0 = arith.constant 0 : i32
    return %arg0, %c0_i32 : i32, i32
  }
  func.func @transform_2(%arg0: i32) -> (i32, i32) {
    %c0_i32 = arith.constant 0 : i32
    %c0_i32_0 = arith.constant 0 : i32
    return %c0_i32, %arg0 : i32, i32
  }
}

</mosaic_0001>

<bundles_post_ra>
// kernel: tpu_custom_call.1
= control target key start
LH: loop header
LB: loop body
LE: loop exit
PB: predicated region body
PF: predicated region fallthrough
CT: control target
= control target key end

     0   :  { %vm14_vm0 = vcmask 261120   ;;  %s124_s0 = inlined_call_operand.vmem [shape: s32[8,1], index: 0, kind: input, shape index: {}]   ;;  %s125_s1 = inlined_call_operand.vmem [shape: f32[8,32], index: 1, kind: input, shape index: {}]   ;;  %s126_s2 = inlined_call_operand.hbm [shape: f32[1,8], index: 2, kind: output, shape index: {}]  }
   0x1   :  { %v12_v0 = vld [vmem:[%s125_s1] sm:$0xff] }
   0x2   :  { %7 = vsyncpa [#allocation3], 0  ;;  %v15_v1 = vsel %vm14_vm0, %v12_v0, -inf  ;;  %v94_v2 = vmov 0   ;;  %v13_v3 = vld [vmem:[%s124_s0] sm:$0xff]  ;;  %v26_v9 = vlaneseq  ;;  %s96_s0 = smov [#allocation2]  }
   0x3   :  { %63 = vset.pattern.permute.xlu0 %v94_v2  ;;  %v95_v12 = vmov 0.003125   ;;  %s49_s1 = sshll.u32 %s96_s0, 4  ;;  %s51_s15 = sshll.u32 %s126_s2, 4  ;;  %vm42_vm2 = vcmask 57344   ;;  %s50_s1 = int_to_ptr.vmem [resolvable:$true] %s49_s1  ;;  %s52_s15 = int_to_ptr.hbm [resolvable:$true] %s51_s15 }
   0x4   :  { %16 = vmax.xlane.f32.xlu0 %v15_v1  ;;  %v27_v10 = vand.u32 127, %v26_v9 }
  0x18   :  { %29 = vperm.xlu0 %63, %v13_v3  }
  0x77   :  { %v17_v4 = vpop.xlane.xlu0 %16 }
  0x78   :  { %v18_v5 = vsub.f32 %v12_v0, %v17_v4 }
  0x7a   :  { %v19_v6 = vmul.f32 1.442695, %v18_v5 }
  0x7c   :  { %64 = vpow2.f32 %v19_v6 }
  0x82   :  { %v65_v7 = vpop.eup %64 }
  0x83   :  { %v21_v8 = vsel %vm14_vm0, %v65_v7, 0.0 }
  0x84   :  { %22 = vadd.xlane.f32.xlu1 %v21_v8 }
  0x8a   :  { %v30_v11 = vpop.permute.xlu0 %29 }
  0x8b   :  { %vm31_vm1 = vcmp.eq.s32.totalorder %v27_v10, %v30_v11 }
  0x8c   :  { %v32_v13 = vsel %vm31_vm1, 0.9, %v95_v12 }
  0x8d   :  { %v33_v14 = vmul.f32 %v32_v13, %v18_v5 }
  0x8f   :  { %v34_v15 = vsel %vm14_vm0, %v33_v14, 0.0 }
  0x90   :  { %35 = vadd.xlane.f32.xlu1 %v34_v15 }
  0xf7   :  { %v23_v16 = vpop.xlane.xlu1 %22 }
  0xf8   :  { %66 = vlog2.f32 %v23_v16 }
  0xfe   :  { %v67_v17 = vpop.eup %66 }
  0xff   :  { %v25_v18 = vmul.f32 0.6931472, %v67_v17 }
 0x101   :  { %v37_v19 = vmul.f32 0.996875, %v25_v18 }
 0x103   :  { %v36_v20 = vpop.xlane.xlu1 %35 }
 0x104   :  { %v38_v21 = vsub.f32 %v37_v19, %v36_v20 }
 0x106   :  { %v40_v22 = vperm.slane %v38_v21, %v27_v10 }
 0x108   :  { %43 = vst.msk [vmem:[#allocation2] sm:$0x1] %vm42_vm2, %v40_v22 }
 0x109   :  { %54 = dma.vmem_to_hbm [thread:$0]  %s50_s1, 16, %s52_s15, [#allocation3]  }
 0x10a   :  { %92 = dma.done.wait [#allocation3], 16  }
 0x10b   :  { %93 = vsyncadd [#allocation3], 4294967280 }
 0x10c   :  { %59 = vsyncpa [#allocation3], 1 }

</bundles_post_ra>
